<compile_context>
chip_gen: v6e
topology: v6e:2x2x1
jax: 0.10.0
libtpu: 0.0.40
codegen_flags: <defaults>
</compile_context>

<pallas_src>
import functools

import jax
import jax.numpy as jnp
from jax.experimental import pallas as pl
from jax.experimental.pallas import tpu as pltpu

_LANE = 128          # vreg lane width
_SUBLANE = 8         # vreg sublane height
_MAX_TILE_M = 512    # ~85% of HBM roofline for mem-bound tiles; fits VMEM
                     # comfortably on v7x's 64 MiB even with f32 + headroom.


def _round_up(x, m):
    return (x + m - 1) // m * m


def _mlp_kernel(x_ref, w1_ref, b1_ref, w2_ref, b2_ref, out_ref):
    """Fused fc1 -> ReLU -> fc2 -> ReLU on one (TILE_M, input_dim) row tile.

    x_ref:  (TILE_M, input_dim)
    w1_ref: (input_dim, hidden_pad)   b1_ref: (1, hidden_pad)
    w2_ref: (hidden_pad, latent_pad)  b2_ref: (1, latent_pad)
    out_ref:(TILE_M, latent_pad)
    """
    x = x_ref[...]
    # fc1 (MXU, f32 accumulation) + bias + ReLU in f32.
    h = jnp.dot(x, w1_ref[...], preferred_element_type=jnp.float32)
    h = jnp.maximum(h + b1_ref[...], 0.0)          # (1, H) broadcasts over rows
    # fc2 + bias + ReLU; cast h to the weight dtype only at the dot operand.
    o = jnp.dot(h.astype(w2_ref.dtype), w2_ref[...],
                preferred_element_type=jnp.float32)
    o = jnp.maximum(o + b2_ref[...], 0.0)
    out_ref[...] = o.astype(out_ref.dtype)


@jax.jit
def protonet_forward(inputs, w1, b1, w2, b2):
    """inputs: (K, N, input_dim) -> (K, N, latent_dim).

    Weights are stored as (in_features, out_features) — i.e. PyTorch Linear
    weights transposed once at parameter-construction time.
    """
    K, N, input_dim = inputs.shape
    hidden_dim = w1.shape[1]
    latent_dim = w2.shape[1]
    M = K * N

    # Lane-dense feature dims.
    hidden_pad = _round_up(hidden_dim, _LANE)
    latent_pad = _round_up(latent_dim, _LANE)

    # Row tiling: tile_m is sublane-aligned; M padded to a tile multiple.
    tile_m = min(_MAX_TILE_M, _round_up(M, _SUBLANE))
    m_pad = _round_up(M, tile_m)
    grid_m = m_pad // tile_m

    x2d = inputs.reshape(M, input_dim)
    if m_pad != M:
        x2d = jnp.pad(x2d, ((0, m_pad - M), (0, 0)))

    # Zero-pad weights/biases up to lane width (exact; see header comment).
    w1p = jnp.pad(w1, ((0, 0), (0, hidden_pad - hidden_dim)))
    b1p = jnp.pad(b1, ((0, hidden_pad - hidden_dim),)).reshape(1, hidden_pad)
    w2p = jnp.pad(w2, ((0, hidden_pad - hidden_dim),
                       (0, latent_pad - latent_dim)))
    b2p = jnp.pad(b2, ((0, latent_pad - latent_dim),)).reshape(1, latent_pad)

    out2d = pl.pallas_call(
        _mlp_kernel,
        out_shape=jax.ShapeDtypeStruct((m_pad, latent_pad), inputs.dtype),
        grid_spec=pltpu.PrefetchScalarGridSpec(
            num_scalar_prefetch=0,
            grid=(grid_m,),
            in_specs=[
                # x: tiled over rows, double-buffered by the Pallas pipeline.
                pl.BlockSpec((tile_m, input_dim), lambda i: (i, 0)),
                # Weights/biases: full blocks, VMEM-resident across the grid.
                pl.BlockSpec((input_dim, hidden_pad), lambda i: (0, 0)),
                pl.BlockSpec((1, hidden_pad), lambda i: (0, 0)),
                pl.BlockSpec((hidden_pad, latent_pad), lambda i: (0, 0)),
                pl.BlockSpec((1, latent_pad), lambda i: (0, 0)),
            ],
            out_specs=pl.BlockSpec((tile_m, latent_pad), lambda i: (i, 0)),
        ),
        compiler_params=pltpu.CompilerParams(
            # Independent row tiles: shard across both TCs on v7x.
            dimension_semantics=("parallel",),
            vmem_limit_bytes=64 * 1024 * 1024,
        ),
    )(x2d, w1p, b1p, w2p, b2p)

    return out2d[:M, :latent_dim].reshape(K, N, latent_dim)


def init_protonet_params(key, input_dim, hidden_dim, latent_dim,
                         dtype=jnp.float32):
    """Deterministic init matching nn.Linear's U(-1/sqrt(fan_in), +1/sqrt(fan_in)).

    Weights are returned already transposed to (in_features, out_features).
    """
    k1, k2, k3, k4 = jax.random.split(key, 4)
    bound1 = 1.0 / jnp.sqrt(input_dim)
    bound2 = 1.0 / jnp.sqrt(hidden_dim)
    w1 = jax.random.uniform(k1, (input_dim, hidden_dim), dtype,
                            minval=-bound1, maxval=bound1)
    b1 = jax.random.uniform(k2, (hidden_dim,), dtype,
                            minval=-bound1, maxval=bound1)
    w2 = jax.random.uniform(k3, (hidden_dim, latent_dim), dtype,
                            minval=-bound2, maxval=bound2)
    b2 = jax.random.uniform(k4, (latent_dim,), dtype,
                            minval=-bound2, maxval=bound2)
    return w1, b1, w2, b2


if __name__ == "__main__":
    # Small shapes consistent with the module's forward: (K, N, input_dim).
    K, N = 2, 8
    input_dim, hidden_dim, latent_dim = 16, 32, 16

    key = jax.random.PRNGKey(0)
    k_in, k_params = jax.random.split(key)

    inputs = jax.random.normal(k_in, (K, N, input_dim), dtype=jnp.float32)
    w1, b1, w2, b2 = init_protonet_params(k_params, input_dim, hidden_dim,
                                          latent_dim)

    out = protonet_forward(inputs, w1, b1, w2, b2)
    out = jax.block_until_ready(out)

    # Pure-JAX reference check (Linear -> ReLU -> Linear -> ReLU).
    ref = jnp.maximum(
        jnp.maximum(inputs.reshape(K * N, input_dim) @ w1 + b1, 0.0) @ w2 + b2,
        0.0).reshape(K, N, latent_dim)
    assert out.shape == (K, N, latent_dim)
    assert jnp.allclose(out, ref, atol=1e-5, rtol=1e-5)

    print("KERNEL_OK")
</pallas_src>

<mosaic_0001>
module attributes {stable_mosaic.version = 11 : i64} {
  func.func @_mlp_kernel(%arg0: i32, %arg1: memref<16x16xf32, #tpu.memory_space<vmem>>, %arg2: memref<16x128xf32, #tpu.memory_space<vmem>>, %arg3: memref<1x128xf32, #tpu.memory_space<vmem>>, %arg4: memref<128x128xf32, #tpu.memory_space<vmem>>, %arg5: memref<1x128xf32, #tpu.memory_space<vmem>>, %arg6: memref<16x128xf32, #tpu.memory_space<vmem>>) attributes {dimension_semantics = [#tpu.dimension_semantics<parallel>], iteration_bounds = array<i64: 1>, scalar_prefetch = 0 : i64, scratch_operands = 0 : i64, tpu.core_type = #tpu.core_type<tc>, window_params = [{transform_indices = @transform_0, window_bounds = array<i64: 16, 16>}, {pipeline_mode = #tpu.pipeline_mode<synchronous>, transform_indices = @transform_1, window_bounds = array<i64: 16, 128>}, {pipeline_mode = #tpu.pipeline_mode<synchronous>, transform_indices = @transform_2, window_bounds = array<i64: 1, 128>}, {pipeline_mode = #tpu.pipeline_mode<synchronous>, transform_indices = @transform_3, window_bounds = array<i64: 128, 128>}, {pipeline_mode = #tpu.pipeline_mode<synchronous>, transform_indices = @transform_4, window_bounds = array<i64: 1, 128>}, {transform_indices = @transform_5, window_bounds = array<i64: 16, 128>}]} {
    %c0 = arith.constant 0 : index
    %c0_0 = arith.constant 0 : index
    %0 = vector.load %arg1[%c0, %c0_0] : memref<16x16xf32, #tpu.memory_space<vmem>>, vector<16x16xf32>
    %c0_1 = arith.constant 0 : index
    %c0_2 = arith.constant 0 : index
    %1 = vector.load %arg2[%c0_1, %c0_2] : memref<16x128xf32, #tpu.memory_space<vmem>>, vector<16x128xf32>
    %cst = arith.constant dense<0.000000e+00> : vector<16x128xf32>
    %2 = tpu.matmul %0, %1, %cst {dimension_numbers = #tpu.dot_dimension_numbers<[1], [0], [0], [1], [0, 0, 1, 1], [], []>} : vector<16x16xf32>, vector<16x128xf32>, vector<16x128xf32> -> vector<16x128xf32>
    %c0_3 = arith.constant 0 : index
    %c0_4 = arith.constant 0 : index
    %3 = vector.load %arg3[%c0_3, %c0_4] : memref<1x128xf32, #tpu.memory_space<vmem>>, vector<1x128xf32>
    %4 = vector.broadcast %3 : vector<1x128xf32> to vector<16x128xf32>
    %5 = arith.addf %2, %4 : vector<16x128xf32>
    %cst_5 = arith.constant 0.000000e+00 : f32
    %6 = vector.broadcast %cst_5 : f32 to vector<16x128xf32>
    %7 = arith.maximumf %5, %6 : vector<16x128xf32>
    %c0_6 = arith.constant 0 : index
    %c0_7 = arith.constant 0 : index
    %8 = vector.load %arg4[%c0_6, %c0_7] : memref<128x128xf32, #tpu.memory_space<vmem>>, vector<128x128xf32>
    %cst_8 = arith.constant dense<0.000000e+00> : vector<16x128xf32>
    %9 = tpu.matmul %7, %8, %cst_8 {dimension_numbers = #tpu.dot_dimension_numbers<[1], [0], [0], [1], [0, 0, 1, 1], [], []>} : vector<16x128xf32>, vector<128x128xf32>, vector<16x128xf32> -> vector<16x128xf32>
    %c0_9 = arith.constant 0 : index
    %c0_10 = arith.constant 0 : index
    %10 = vector.load %arg5[%c0_9, %c0_10] : memref<1x128xf32, #tpu.memory_space<vmem>>, vector<1x128xf32>
    %11 = vector.broadcast %10 : vector<1x128xf32> to vector<16x128xf32>
    %12 = arith.addf %9, %11 : vector<16x128xf32>
    %cst_11 = arith.constant 0.000000e+00 : f32
    %13 = vector.broadcast %cst_11 : f32 to vector<16x128xf32>
    %14 = arith.maximumf %12, %13 : vector<16x128xf32>
    %c0_12 = arith.constant 0 : index
    %c0_13 = arith.constant 0 : index
    %15 = vector.load %arg6[%c0_12, %c0_13] : memref<16x128xf32, #tpu.memory_space<vmem>>, vector<16x128xf32>
    tpu.vector_store %arg6[%c0_12, %c0_13], %14 {strides = array<i32>} : memref<16x128xf32, #tpu.memory_space<vmem>>, vector<16x128xf32>,
    return
  }
  func.func @transform_0(%arg0: i32) -> (i32, i32) {
    %c0_i32 = arith.constant 0 : i32
    %c0_i32_0 = arith.constant 0 : i32
    return %arg0, %c0_i32 : i32, i32
  }
  func.func @transform_1(%arg0: i32) -> (i32, i32) {
    %c0_i32 = arith.constant 0 : i32
    %c0_i32_0 = arith.constant 0 : i32
    %c0_i32_1 = arith.constant 0 : i32
    return %c0_i32, %c0_i32_0 : i32, i32
  }
  func.func @transform_2(%arg0: i32) -> (i32, i32) {
    %c0_i32 = arith.constant 0 : i32
    %c0_i32_0 = arith.constant 0 : i32
    %c0_i32_1 = arith.constant 0 : i32
    return %c0_i32, %c0_i32_0 : i32, i32
  }
  func.func @transform_3(%arg0: i32) -> (i32, i32) {
    %c0_i32 = arith.constant 0 : i32
    %c0_i32_0 = arith.constant 0 : i32
    %c0_i32_1 = arith.constant 0 : i32
    return %c0_i32, %c0_i32_0 : i32, i32
  }
  func.func @transform_4(%arg0: i32) -> (i32, i32) {
    %c0_i32 = arith.constant 0 : i32
    %c0_i32_0 = arith.constant 0 : i32
    %c0_i32_1 = arith.constant 0 : i32
    return %c0_i32, %c0_i32_0 : i32, i32
  }
  func.func @transform_5(%arg0: i32) -> (i32, i32) {
    %c0_i32 = arith.constant 0 : i32
    %c0_i32_0 = arith.constant 0 : i32
    return %arg0, %c0_i32 : i32, i32
  }
}

</mosaic_0001>

<bundles_post_ra>
// kernel: protonet_forward.1
= control target key start
LH: loop header
LB: loop body
LE: loop exit
PB: predicated region body
PF: predicated region fallthrough
CT: control target
= control target key end

     0   :  { %vm31_vm0 = vcmask 130048   ;;  %s393_s1 = inlined_call_operand.vmem [shape: f32[16,128], index: 1, kind: input, shape index: {}]   ;;  %s394_s0 = inlined_call_operand.vmem [shape: f32[16,16], index: 0, kind: input, shape index: {}]   ;;  %s395_s3 = inlined_call_operand.vmem [shape: f32[128,128], index: 3, kind: input, shape index: {}]   ;;  %s396_s2 = inlined_call_operand.vmem [shape: f32[1,128], index: 2, kind: input, shape index: {}]   ;;  %s397_s4 = inlined_call_operand.vmem [shape: f32[1,128], index: 4, kind: input, shape index: {}]   ;;  %s398_s5 = inlined_call_operand.vmem [shape: f32[16,128], index: 5, kind: output, shape index: {}]  }
   0x1   :  { %v23_v0 = vld [vmem:[%s393_s1 + $0x8] sm:$0xff]  ;;  %v22_v1 = vld [vmem:[%s393_s1] sm:$0xff]  ;;  %v130_v3 = vld [vmem:[%s395_s3 + $0x78] sm:$0xff] }
   0x2   :  { %v20_v2 = vld [vmem:[%s394_s0] sm:$0xff]  ;;  %247 = vmatprep.subr.mxu0 %v23_v0  ;;  %v129_v4 = vld [vmem:[%s395_s3 + $0x70] sm:$0xff]  ;;  %v21_v5 = vld [vmem:[%s394_s0 + $0x8] sm:$0xff]  ;;  %254 = vmatprep.subr.mxu1 %v130_v3 }
   0x3   :  { %251 = vmatprep.mubr.msk.f32.mxu0 %vm31_vm0, %v20_v2  ;;  %248 = vmatpush3.msra.mxu0 %v23_v0  ;;  %v128_v6 = vld [vmem:[%s395_s3 + $0x68] sm:$0xff]  ;;  %v127_v7 = vld [vmem:[%s395_s3 + $0x60] sm:$0xff]  ;;  %v126_v8 = vld [vmem:[%s395_s3 + $0x58] sm:$0xff] }
   0x4   :  { %249 = vmatprep.subr.mxu0 %v22_v1  ;;  %255 = vmatpush3.msra.mxu1 %v130_v3  ;;  %v125_v9 = vld [vmem:[%s395_s3 + $0x50] sm:$0xff]  ;;  %v124_v10 = vld [vmem:[%s395_s3 + $0x48] sm:$0xff]  ;;  %v123_v11 = vld [vmem:[%s395_s3 + $0x40] sm:$0xff] }
   0x5   :  { %250 = vmatpush3.msra.mxu0 %v22_v1  ;;  %256 = vmatprep.subr.mxu1 %v129_v4  ;;  %v122_v12 = vld [vmem:[%s395_s3 + $0x38] sm:$0xff]  ;;  %v121_v13 = vld [vmem:[%s395_s3 + $0x30] sm:$0xff]  ;;  %v120_v14 = vld [vmem:[%s395_s3 + $0x28] sm:$0xff] }
   0x6   :  { %252 = vmatmul.mubr.msk.f32.vlgmr.msra.gmra.mxu0 %vm31_vm0, %v21_v5  ;;  %257 = vmatpush3.msra.mxu1 %v129_v4  ;;  %v119_v15 = vld [vmem:[%s395_s3 + $0x20] sm:$0xff]  ;;  %v118_v16 = vld [vmem:[%s395_s3 + $0x18] sm:$0xff]  ;;  %v117_v17 = vld [vmem:[%s395_s3 + $0x10] sm:$0xff] }
   0x7   :  { %258 = vmatprep.subr.mxu1 %v128_v6  ;;  %v116_v18 = vld [vmem:[%s395_s3 + $0x8] sm:$0xff]  ;;  %v115_v19 = vld [vmem:[%s395_s3] sm:$0xff] }
   0x8   :  { %259 = vmatpush3.msra.mxu1 %v128_v6  ;;  %v221_v20 = vld [vmem:[%s396_s2] ss:$0 sm:$0xff] }
   0x9   :  { %260 = vmatprep.subr.mxu1 %v127_v7  ;;  %v224_v27 = vld [vmem:[%s397_s4] ss:$0 sm:$0xff] }
   0xa   :  { %261 = vmatpush3.msra.mxu1 %v127_v7 }
   0xb   :  { %262 = vmatprep.subr.mxu1 %v126_v8 }
   0xc   :  { %263 = vmatpush3.msra.mxu1 %v126_v8 }
   0xd   :  { %264 = vmatprep.subr.mxu1 %v125_v9 }
   0xe   :  { %265 = vmatpush3.msra.mxu1 %v125_v9 }
   0xf   :  { %266 = vmatprep.subr.mxu1 %v124_v10 }
  0x10   :  { %267 = vmatpush3.msra.mxu1 %v124_v10 }
  0x11   :  { %268 = vmatprep.subr.mxu1 %v123_v11 }
  0x12   :  { %269 = vmatpush3.msra.mxu1 %v123_v11 }
  0x13   :  { %270 = vmatprep.subr.mxu1 %v122_v12 }
  0x14   :  { %271 = vmatpush3.msra.mxu1 %v122_v12 }
  0x15   :  { %272 = vmatprep.subr.mxu1 %v121_v13 }
  0x16   :  { %273 = vmatpush3.msra.mxu1 %v121_v13 }
  0x17   :  { %274 = vmatprep.subr.mxu1 %v120_v14 }
  0x18   :  { %275 = vmatpush3.msra.mxu1 %v120_v14 }
  0x19   :  { %276 = vmatprep.subr.mxu1 %v119_v15 }
  0x1a   :  { %277 = vmatpush3.msra.mxu1 %v119_v15 }
  0x1b   :  { %278 = vmatprep.subr.mxu1 %v118_v16 }
  0x1c   :  { %279 = vmatpush3.msra.mxu1 %v118_v16 }
  0x1d   :  { %280 = vmatprep.subr.mxu1 %v117_v17 }
  0x1e   :  { %281 = vmatpush3.msra.mxu1 %v117_v17 }
  0x1f   :  { %282 = vmatprep.subr.mxu1 %v116_v18 }
  0x20   :  { %283 = vmatpush3.msra.mxu1 %v116_v18 }
  0x21   :  { %284 = vmatprep.subr.mxu1 %v115_v19 }
  0x22   :  { %285 = vmatpush3.msra.mxu1 %v115_v19 }
  0xc6   :  { %v253_v21 = vpop.f32.mrf.mxu0 }
  0xc7   :  { %v110_v22 = vadd.f32 %v253_v21, %v221_v20 }
  0xc8   :  { %v104_v23 = vpop.f32.mrf.mxu0 }
  0xc9   :  { %v105_v24 = vadd.f32 %v221_v20, %v104_v23  ;;  %v114_v26 = vmax.f32 %v110_v22, 0.0 }
  0xcb   :  { %v113_v25 = vmax.f32 %v105_v24, 0.0 }
  0xcd   :  { %286 = vmatprep.mubr.f32.mxu1 %v113_v25 }
  0xce   :  { %287 = vmatmul.mubr.f32.vlgmr.msra.gmra.mxu1 %v114_v26 }
 0x18e   :  { %v288_v28 = vpop.f32.mrf.mxu1 }
 0x18f   :  { %v210_v29 = vadd.f32 %v288_v28, %v224_v27 }
 0x190   :  { %v204_v30 = vpop.f32.mrf.mxu1 }
 0x191   :  { %v214_v31 = vmax.f32 %v210_v29, 0.0  ;;  %v205_v32 = vadd.f32 %v224_v27, %v204_v30 }
 0x193   :  { %216 = vst [vmem:[%s398_s5 + $0x8] sm:$0xff] %v214_v31  ;;  %v213_v33 = vmax.f32 %v205_v32, 0.0 }
 0x195   :  { %215 = vst [vmem:[%s398_s5] sm:$0xff] %v213_v33 }

</bundles_post_ra>
